<compile_context>
chip_gen: v7x
topology: tpu7x:2x2x1
jax: 0.10.0
libtpu: 0.0.40
codegen_flags: <defaults>
</compile_context>

<pallas_src>
import functools

import jax
import jax.numpy as jnp
import numpy as np
from jax.experimental import pallas as pl
from jax.experimental.pallas import tpu as pltpu

KSIZE = 3  # 3x3 convolutions, padding=1, stride=1


# ------------------------------ Pallas kernel -------------------------------

def _band3(v):
    """rows3[i] = [v[i-1] | v[i] | v[i+1]] with zero out-of-range neighbours.

    v: (Mp, WC) f32 stacked padded rows whose halo/separator rows are zero.
    (pltpu.roll(axis=0) is the XLU-friendly alternative; explicit zero-row
    concat is used here so the shift direction is unambiguous.)
    """
    zrow = jnp.zeros((1, v.shape[1]), v.dtype)
    up = jnp.concatenate([zrow, v[:-1, :]], axis=0)     # up[i]   = v[i-1]
    down = jnp.concatenate([v[1:, :], zrow], axis=0)    # down[i] = v[i+1]
    return jnp.concatenate([up, v, down], axis=1)       # (Mp, 3*WC)


def _fused_residual_kernel(x_ref, w1_ref, b1_ref, w2_ref, b2_ref, o_ref, *, hp):
    """Fused conv1+BN1+ReLU -> conv2+BN2 -> +x -> ReLU for a block of images.

    x_ref  : (1, Mp, W*Cin)  bf16, Mp = nb*(H+2) padded rows (zero halo rows
             act as both H padding and separators between stacked images)
    w*_ref : (3*W*Cin, W*Cout) bf16 banded weights (see _band_weights)
    b*_ref : (1, W*Cout) f32 folded-BN bias tiled per output pixel
    o_ref  : (1, Mp, W*Cout) f32 (halo rows are don't-care, sliced off outside)
    """
    x = x_ref[0].astype(jnp.float32)                     # (Mp, WC)
    mp, wc = x.shape

    # Rows with (row % hp) in {0, hp-1} are per-image zero-halo rows.
    rid = jax.lax.broadcasted_iota(jnp.int32, (mp, wc), 0) % hp
    interior = jnp.logical_and(rid != 0, rid != hp - 1)

    def conv(v, w_ref, b_ref):
        # Single MXU dot per conv: K = 3*W*Cin, N = W*Cout (lane dense),
        # M = Mp stacked rows; bf16 operands, f32 accumulation.
        rows3 = _band3(v).astype(jnp.bfloat16)
        return jnp.dot(rows3, w_ref[...],
                       preferred_element_type=jnp.float32) + b_ref[...]

    y1 = jnp.maximum(conv(x, w1_ref, b1_ref), 0.0)       # conv1 + BN1 + ReLU
    y1 = jnp.where(interior, y1, 0.0)                    # restore zero halo rows
    y2 = conv(y1, w2_ref, b2_ref)                        # conv2 + BN2
    o_ref[0] = jnp.maximum(x + y2, 0.0).astype(o_ref.dtype)   # +x, ReLU


# ------------------------------ JAX wrappers ---------------------------------

def _band_weights(w_hwio, W):
    """Fold a 3x3 HWIO kernel (+ width zero-pad) into a banded matmul weight.

    M[kh*W*Cin + (w+kw-1)*Cin + ci, w*Cout + co] = w_hwio[kh, kw, ci, co]
    for 0 <= w+kw-1 < W (out-of-range columns dropped == zero padding in W).
    """
    KH, KW, Cin, Cout = w_hwio.shape
    eye = jnp.eye(W, dtype=w_hwio.dtype)
    blocks = []
    for kh in range(KH):
        m = jnp.zeros((W * Cin, W * Cout), w_hwio.dtype)
        for kw in range(KW):
            blockdiag = jnp.einsum("ij,kl->ikjl", eye,
                                   w_hwio[kh, kw]).reshape(W * Cin, W * Cout)
            padded = jnp.pad(blockdiag, ((Cin, Cin), (0, 0)))
            start = (2 - kw) * Cin                     # shift rows by (kw-1)*Cin
            m = m + padded[start:start + W * Cin, :]
        blocks.append(m)
    return jnp.concatenate(blocks, axis=0)


def residual_block_forward(x_nchw, w1, b1, w2, b2, *, images_per_step=None):
    """ResidualBlock.forward with shortcut=True (nin == nout, stride=1)."""
    N, Cin, H, W = x_nchw.shape
    KH, KW, _, Cout = w1.shape
    if (KH, KW) != (KSIZE, KSIZE) or Cin != Cout or w1.shape[2] != Cin:
        # TODO(synk): shortcut=False / stride=2 projection path (block2) is not
        # reproduced; only the identity-shortcut configuration is supported.
        raise ValueError("fused kernel supports 3x3, stride=1, nin==nout only")
    WCi, WCo = W * Cin, W * Cout
    if WCi % 128 != 0:
        raise ValueError("lane-dense layout requires W*Cin to be a multiple of 128")
    hp = H + 2

    # Images stacked per grid step: fill the MXU M dimension / amortise the
    # ~0.35us per-step overhead, but keep >= 2 grid steps when the batch allows
    # it so the "parallel" axis can shard across v7x's two TensorCores.
    nb = images_per_step
    if nb is None:
        nb = max(1, min(N, 256 // hp))
        if N >= 2:
            nb = max(1, min(nb, N // 2))
        while N % nb:
            nb -= 1
    assert N % nb == 0
    g = N // nb
    mp = nb * hp

    # NCHW -> lane-dense stacked rows with a 1-row zero halo per image:
    # (N,C,H,W) -> (N,H,W*C) -> pad H -> (G, nb*(H+2), W*C), bf16.
    # TODO(synk): at real scale keep this padded lane-dense layout as the
    # persistent inter-layer activation format instead of transposing
    # NCHW<->NHWC around every block (extra full-array HBM round trips).
    x = jnp.transpose(x_nchw, (0, 2, 3, 1)).reshape(N, H, WCi)
    x = jnp.pad(x, ((0, 0), (1, 1), (0, 0)))
    x = x.reshape(g, mp, WCi).astype(jnp.bfloat16)

    w1b = _band_weights(w1, W).astype(jnp.bfloat16)
    w2b = _band_weights(w2, W).astype(jnp.bfloat16)
    b1f = jnp.tile(b1, W).reshape(1, WCo).astype(jnp.float32)
    b2f = jnp.tile(b2, W).reshape(1, WCo).astype(jnp.float32)

    kernel = functools.partial(_fused_residual_kernel, hp=hp)
    const = lambda i: (0, 0)   # grid-invariant weight/bias blocks

    out = pl.pallas_call(
        kernel,
        out_shape=jax.ShapeDtypeStruct((g, mp, WCo), jnp.float32),
        grid_spec=pltpu.PrefetchScalarGridSpec(
            num_scalar_prefetch=0,
            grid=(g,),
            in_specs=[
                pl.BlockSpec((1, mp, WCi), lambda i: (i, 0, 0)),
                # Constant blocks: single-buffer so the dead second pipeline
                # buffer does not consume VMEM as W*C grows.
                pl.BlockSpec((KSIZE * WCi, WCo), const, pipeline_mode=pl.Buffered(1)),
                pl.BlockSpec((1, WCo), const, pipeline_mode=pl.Buffered(1)),
                pl.BlockSpec((KSIZE * WCi, WCo), const, pipeline_mode=pl.Buffered(1)),
                pl.BlockSpec((1, WCo), const, pipeline_mode=pl.Buffered(1)),
            ],
            out_specs=pl.BlockSpec((1, mp, WCo), lambda i: (i, 0, 0)),
        ),
        compiler_params=pltpu.CompilerParams(
            dimension_semantics=("parallel",),
            # Above v6e's 32 MiB default scoped limit, below v7x's 64 MiB
            # physical VMEM (headroom) -- matters once blocks / W*C grow.
            vmem_limit_bytes=48 * 1024 * 1024,
        ),
    )(x, w1b, b1f, w2b, b2f)

    out = out.reshape(N, hp, W, Cout)[:, 1:H + 1]        # drop halo rows
    return jnp.transpose(out, (0, 3, 1, 2))              # -> NCHW


# ------------------------- deterministic parameters -------------------------

def _fold_bn(w, conv_bias, gamma, beta, mean, var, eps=1e-5):
    """Fold inference-mode BatchNorm into HWIO conv weights + bias."""
    scale = gamma / jnp.sqrt(var + eps)            # (Cout,)
    return w * scale, (conv_bias - mean) * scale + beta


def make_params(key, nin, nout):
    ks = jax.random.split(key, 12)
    s = 0.1

    def conv_bn(k0, k1, k2, k3, k4, k5, cin, cout):
        w = s * jax.random.normal(k0, (KSIZE, KSIZE, cin, cout), jnp.float32)
        cb = s * jax.random.normal(k1, (cout,), jnp.float32)
        gamma = 1.0 + 0.1 * jax.random.normal(k2, (cout,), jnp.float32)
        beta = 0.1 * jax.random.normal(k3, (cout,), jnp.float32)
        mean = 0.1 * jax.random.normal(k4, (cout,), jnp.float32)
        var = jax.random.uniform(k5, (cout,), jnp.float32, 0.5, 1.5)
        return _fold_bn(w, cb, gamma, beta, mean, var)

    w1, b1 = conv_bn(*ks[0:6], nin, nout)
    w2, b2 = conv_bn(*ks[6:12], nout, nout)
    return w1, b1, w2, b2


# ------------------------------ pure-JAX ref ---------------------------------

def reference_nhwc(x, w1, b1, w2, b2):
    dn = jax.lax.conv_dimension_numbers(x.shape, w1.shape, ("NHWC", "HWIO", "NHWC"))
    y = jax.lax.conv_general_dilated(x, w1, (1, 1), [(1, 1), (1, 1)],
                                     dimension_numbers=dn) + b1
    y = jnp.maximum(y, 0.0)
    y = jax.lax.conv_general_dilated(y, w2, (1, 1), [(1, 1), (1, 1)],
                                     dimension_numbers=dn) + b2
    return jnp.maximum(x + y, 0.0)


# ----------------------------------- main ------------------------------------

if __name__ == "__main__":
    key = jax.random.PRNGKey(0)
    kx, kp = jax.random.split(key)

    N, C, H, W = 8, 8, 16, 16                      # W*C = 128 -> lane-dense rows
    x_nchw = jax.random.normal(kx, (N, C, H, W), jnp.float32)
    w1, b1, w2, b2 = make_params(kp, C, C)

    fwd = jax.jit(residual_block_forward)
    out = jax.block_until_ready(fwd(x_nchw, w1, b1, w2, b2))

    # Sanity check against a pure-f32 JAX reference.  Tolerance reflects bf16
    # MXU operands and the bf16 activation feed (accumulation stays f32).
    x_nhwc = jnp.transpose(x_nchw, (0, 2, 3, 1))
    ref = jnp.transpose(reference_nhwc(x_nhwc, w1, b1, w2, b2), (0, 3, 1, 2))
    np.testing.assert_allclose(np.asarray(out), np.asarray(ref),
                               rtol=5e-2, atol=5e-2)

    # TODO(synk): training-mode BatchNorm (batch statistics + running-stat
    # updates) is not reproduced; inference-mode BN is folded into the convs.
    print("KERNEL_OK")
</pallas_src>

<mosaic_0001>
module attributes {stable_mosaic.version = 11 : i64} {
  func.func @_fused_residual_kernel(%arg0: i32, %arg1: memref<1x72x128xbf16, #tpu.memory_space<vmem>>, %arg2: memref<384x128xbf16, #tpu.memory_space<vmem>>, %arg3: memref<1x128xf32, #tpu.memory_space<vmem>>, %arg4: memref<384x128xbf16, #tpu.memory_space<vmem>>, %arg5: memref<1x128xf32, #tpu.memory_space<vmem>>, %arg6: memref<1x72x128xf32, #tpu.memory_space<vmem>>) attributes {dimension_semantics = [#tpu.dimension_semantics<parallel>], iteration_bounds = array<i64: 2>, scalar_prefetch = 0 : i64, scratch_operands = 0 : i64, tpu.core_type = #tpu.core_type<tc>, window_params = [{transform_indices = @transform_0, window_bounds = array<i64: 1, 72, 128>}, {pipeline_mode = #tpu.pipeline_mode<synchronous>, transform_indices = @transform_1, window_bounds = array<i64: 384, 128>}, {pipeline_mode = #tpu.pipeline_mode<synchronous>, transform_indices = @transform_2, window_bounds = array<i64: 1, 128>}, {pipeline_mode = #tpu.pipeline_mode<synchronous>, transform_indices = @transform_3, window_bounds = array<i64: 384, 128>}, {pipeline_mode = #tpu.pipeline_mode<synchronous>, transform_indices = @transform_4, window_bounds = array<i64: 1, 128>}, {transform_indices = @transform_5, window_bounds = array<i64: 1, 72, 128>}]} {
    %c0 = arith.constant 0 : index
    %c0_0 = arith.constant 0 : index
    %c0_1 = arith.constant 0 : index
    %0 = vector.load %arg1[%c0, %c0_0, %c0_1] : memref<1x72x128xbf16, #tpu.memory_space<vmem>>, vector<1x72x128xbf16>
    %1 = vector.shape_cast %0 : vector<1x72x128xbf16> to vector<72x128xbf16>
    %2 = arith.extf %1 : vector<72x128xbf16> to vector<72x128xf32>
    %3 = tpu.iota {dimensions = array<i32: 0>} : vector<72x128xi32>
    %c18_i32 = arith.constant 18 : i32
    %c0_i32 = arith.constant 0 : i32
    %4 = arith.cmpi eq, %c18_i32, %c0_i32 : i32
    %c1_i32 = arith.constant 1 : i32
    %5 = arith.select %4, %c1_i32, %c18_i32 : i32
    %6 = vector.broadcast %5 : i32 to vector<72x128xi32>
    %7 = arith.remsi %3, %6 : vector<72x128xi32>
    %c0_i32_2 = arith.constant 0 : i32
    %8 = vector.broadcast %c0_i32_2 : i32 to vector<72x128xi32>
    %9 = arith.cmpi ne, %7, %8 : vector<72x128xi32>
    %c0_i32_3 = arith.constant 0 : i32
    %10 = vector.broadcast %c0_i32_3 : i32 to vector<72x128xi32>
    %11 = arith.cmpi slt, %7, %10 : vector<72x128xi32>
    %c0_i32_4 = arith.constant 0 : i32
    %12 = arith.cmpi slt, %5, %c0_i32_4 : i32
    %13 = vector.broadcast %12 : i1 to vector<72x128xi1>
    %14 = vector.broadcast %13 : vector<72x128xi1> to vector<72x128xi1>
    %15 = arith.xori %11, %14 : vector<72x128xi1>
    %16 = arith.andi %15, %9 : vector<72x128xi1>
    %17 = vector.broadcast %5 : i32 to vector<72x128xi32>
    %18 = arith.addi %7, %17 : vector<72x128xi32>
    %19 = arith.select %16, %18, %7 : vector<72x128xi1>, vector<72x128xi32>
    %c0_i32_5 = arith.constant 0 : i32
    %20 = vector.broadcast %c0_i32_5 : i32 to vector<72x128xi32>
    %21 = arith.cmpi ne, %19, %20 : vector<72x128xi32>
    %c17_i32 = arith.constant 17 : i32
    %22 = vector.broadcast %c17_i32 : i32 to vector<72x128xi32>
    %23 = arith.cmpi ne, %19, %22 : vector<72x128xi32>
    %24 = arith.andi %21, %23 : vector<72x128xi1>
    %cst = arith.constant 0.000000e+00 : f32
    %25 = vector.broadcast %cst : f32 to vector<1x128xf32>
    %26 = vector.extract_strided_slice %2 {offsets = [0, 0], sizes = [71, 128], strides = [1, 1]} : vector<72x128xf32> to vector<71x128xf32>
    %27 = tpu.concatenate %25, %26 in 0 : vector<1x128xf32>, vector<71x128xf32> -> vector<72x128xf32>
    %28 = vector.extract_strided_slice %2 {offsets = [1, 0], sizes = [71, 128], strides = [1, 1]} : vector<72x128xf32> to vector<71x128xf32>
    %29 = tpu.concatenate %28, %25 in 0 : vector<71x128xf32>, vector<1x128xf32> -> vector<72x128xf32>
    %30 = tpu.concatenate %27, %2, %29 in 1 : vector<72x128xf32>, vector<72x128xf32>, vector<72x128xf32> -> vector<72x384xf32>
    %31 = arith.truncf %30 : vector<72x384xf32> to vector<72x384xbf16>
    %c0_6 = arith.constant 0 : index
    %c0_7 = arith.constant 0 : index
    %32 = vector.load %arg2[%c0_6, %c0_7] : memref<384x128xbf16, #tpu.memory_space<vmem>>, vector<384x128xbf16>
    %cst_8 = arith.constant dense<0.000000e+00> : vector<72x128xf32>
    %33 = tpu.matmul %31, %32, %cst_8 {dimension_numbers = #tpu.dot_dimension_numbers<[1], [0], [0], [1], [0, 0, 1, 1], [], []>} : vector<72x384xbf16>, vector<384x128xbf16>, vector<72x128xf32> -> vector<72x128xf32>
    %c0_9 = arith.constant 0 : index
    %c0_10 = arith.constant 0 : index
    %34 = vector.load %arg3[%c0_9, %c0_10] : memref<1x128xf32, #tpu.memory_space<vmem>>, vector<1x128xf32>
    %35 = vector.broadcast %34 : vector<1x128xf32> to vector<72x128xf32>
    %36 = arith.addf %33, %35 : vector<72x128xf32>
    %cst_11 = arith.constant 0.000000e+00 : f32
    %37 = vector.broadcast %cst_11 : f32 to vector<72x128xf32>
    %38 = arith.maximumf %36, %37 : vector<72x128xf32>
    %cst_12 = arith.constant 0.000000e+00 : f32
    %39 = vector.broadcast %cst_12 : f32 to vector<72x128xf32>
    %40 = arith.select %24, %38, %39 : vector<72x128xi1>, vector<72x128xf32>
    %cst_13 = arith.constant 0.000000e+00 : f32
    %41 = vector.broadcast %cst_13 : f32 to vector<1x128xf32>
    %42 = vector.extract_strided_slice %40 {offsets = [0, 0], sizes = [71, 128], strides = [1, 1]} : vector<72x128xf32> to vector<71x128xf32>
    %43 = tpu.concatenate %41, %42 in 0 : vector<1x128xf32>, vector<71x128xf32> -> vector<72x128xf32>
    %44 = vector.extract_strided_slice %40 {offsets = [1, 0], sizes = [71, 128], strides = [1, 1]} : vector<72x128xf32> to vector<71x128xf32>
    %45 = tpu.concatenate %44, %41 in 0 : vector<71x128xf32>, vector<1x128xf32> -> vector<72x128xf32>
    %46 = tpu.concatenate %43, %40, %45 in 1 : vector<72x128xf32>, vector<72x128xf32>, vector<72x128xf32> -> vector<72x384xf32>
    %47 = arith.truncf %46 : vector<72x384xf32> to vector<72x384xbf16>
    %c0_14 = arith.constant 0 : index
    %c0_15 = arith.constant 0 : index
    %48 = vector.load %arg4[%c0_14, %c0_15] : memref<384x128xbf16, #tpu.memory_space<vmem>>, vector<384x128xbf16>
    %cst_16 = arith.constant dense<0.000000e+00> : vector<72x128xf32>
    %49 = tpu.matmul %47, %48, %cst_16 {dimension_numbers = #tpu.dot_dimension_numbers<[1], [0], [0], [1], [0, 0, 1, 1], [], []>} : vector<72x384xbf16>, vector<384x128xbf16>, vector<72x128xf32> -> vector<72x128xf32>
    %c0_17 = arith.constant 0 : index
    %c0_18 = arith.constant 0 : index
    %50 = vector.load %arg5[%c0_17, %c0_18] : memref<1x128xf32, #tpu.memory_space<vmem>>, vector<1x128xf32>
    %51 = vector.broadcast %50 : vector<1x128xf32> to vector<72x128xf32>
    %52 = arith.addf %49, %51 : vector<72x128xf32>
    %53 = arith.addf %2, %52 : vector<72x128xf32>
    %cst_19 = arith.constant 0.000000e+00 : f32
    %54 = vector.broadcast %cst_19 : f32 to vector<72x128xf32>
    %55 = arith.maximumf %53, %54 : vector<72x128xf32>
    %c0_20 = arith.constant 0 : index
    %c0_21 = arith.constant 0 : index
    %c0_22 = arith.constant 0 : index
    %56 = vector.load %arg6[%c0_20, %c0_21, %c0_22] : memref<1x72x128xf32, #tpu.memory_space<vmem>>, vector<1x72x128xf32>
    %57 = vector.shape_cast %56 : vector<1x72x128xf32> to vector<72x128xf32>
    %58 = vector.shape_cast %55 : vector<72x128xf32> to vector<1x72x128xf32>
    tpu.vector_store %arg6[%c0_20, %c0_21, %c0_22], %58 {strides = array<i32>} : memref<1x72x128xf32, #tpu.memory_space<vmem>>, vector<1x72x128xf32>,
    return
  }
  func.func @transform_0(%arg0: i32) -> (i32, i32, i32) {
    %c0_i32 = arith.constant 0 : i32
    %c0_i32_0 = arith.constant 0 : i32
    %c0_i32_1 = arith.constant 0 : i32
    return %arg0, %c0_i32, %c0_i32_0 : i32, i32, i32
  }
  func.func @transform_1(%arg0: i32) -> (i32, i32) {
    %c0_i32 = arith.constant 0 : i32
    %c0_i32_0 = arith.constant 0 : i32
    %c0_i32_1 = arith.constant 0 : i32
    return %c0_i32, %c0_i32_0 : i32, i32
  }
  func.func @transform_2(%arg0: i32) -> (i32, i32) {
    %c0_i32 = arith.constant 0 : i32
    %c0_i32_0 = arith.constant 0 : i32
    %c0_i32_1 = arith.constant 0 : i32
    return %c0_i32, %c0_i32_0 : i32, i32
  }
  func.func @transform_3(%arg0: i32) -> (i32, i32) {
    %c0_i32 = arith.constant 0 : i32
    %c0_i32_0 = arith.constant 0 : i32
    %c0_i32_1 = arith.constant 0 : i32
    return %c0_i32, %c0_i32_0 : i32, i32
  }
  func.func @transform_4(%arg0: i32) -> (i32, i32) {
    %c0_i32 = arith.constant 0 : i32
    %c0_i32_0 = arith.constant 0 : i32
    %c0_i32_1 = arith.constant 0 : i32
    return %c0_i32, %c0_i32_0 : i32, i32
  }
  func.func @transform_5(%arg0: i32) -> (i32, i32, i32) {
    %c0_i32 = arith.constant 0 : i32
    %c0_i32_0 = arith.constant 0 : i32
    %c0_i32_1 = arith.constant 0 : i32
    return %arg0, %c0_i32, %c0_i32_0 : i32, i32, i32
  }
}

</mosaic_0001>

<bundles_post_ra>
// kernel: tile.13
= control target key start
LH: loop header
LB: loop body
LE: loop exit
PB: predicated region body
PF: predicated region fallthrough
CT: control target
= control target key end

     0   :  { %s28_s0 = inlined_call_operand.vmem [shape: f32[8], index: 0, kind: input, shape index: {}]   ;;  %s29_s1 = inlined_call_operand.vmem [shape: f32[16,8], index: 1, kind: output, shape index: {}]  }
   0x1   :  { %v4_v0 = vld [vmem:[%s28_s0] ss:$0 sm:$0xff] }
   0x2   :  { %5 = vst [vmem:[%s29_s1] sm:$0xff] %v4_v0  ;;  %8 = vst [vmem:[%s29_s1 + $0x8] sm:$0xff] %v4_v0 }

// kernel: tile.14
= control target key start
LH: loop header
LB: loop body
LE: loop exit
PB: predicated region body
PF: predicated region fallthrough
CT: control target
= control target key end

     0   :  { %s131_s10 = smov 120   ;;  %s132_s11 = smov 104   ;;  %vm3_vm0 = vcmask 64512   ;;  %vm9_vm1 = vcmask 1048512   ;;  %vm15_vm2 = vcmask 982912   ;;  %vm21_vm3 = vcmask 917312   ;;  %s207_s0 = inlined_call_operand.vmem [shape: f32[16,8], index: 0, kind: input, shape index: {}]   ;;  %s208_s1 = inlined_call_operand.vmem [shape: f32[1,128], index: 1, kind: output, shape index: {}]  }
   0x1   :  { %v101_v0 = vld [vmem:[%s207_s0 + $0xf] sm:$0x1]   ;;  %v103_v1 = vld [vmem:[%s207_s0 + $0xd] sm:$0x1]   ;;  %v102_v2 = vld [vmem:[%s207_s0 + $0xe] sm:$0x1]  }
   0x2   :  { %7 = vrot.lane.b32.xlu0 %v101_v0, %s131_s10  ;;  %19 = vrot.lane.b32.xlu1 %v103_v1, %s132_s11  ;;  %v104_v3 = vld [vmem:[%s207_s0 + $0xc] sm:$0x1]   ;;  %s133_s16 = smov 112   ;;  %s134_s17 = smov 96   ;;  %v105_v4 = vld [vmem:[%s207_s0 + $0xb] sm:$0x1]  }
   0x3   :  { %v106_v5 = vld [vmem:[%s207_s0 + $0xa] sm:$0x1]   ;;  %v2_v6 = vld [vmem:[%s207_s0] sm:$0x1]   ;;  %s135_s24 = smov 88   ;;  %s136_s25 = smov 80  }
   0x4   :  { %4 = vst.msk [vmem:[#allocation0] sm:$0x1] %vm3_vm0, %v2_v6   ;;  %v107_v7 = vld [vmem:[%s207_s0 + $0x9] sm:$0x1]   ;;  %v108_v8 = vld [vmem:[%s207_s0 + $0x8] sm:$0x1]  }
   0x5   :  { %s137_s30 = smov 72   ;;  %s138_s2 = smov 64   ;;  %v109_v9 = vld [vmem:[%s207_s0 + $0x7] sm:$0x1]   ;;  %v110_v10 = vld [vmem:[%s207_s0 + $0x6] sm:$0x1]  }
   0x6   :  { %13 = vrot.lane.b32.xlu0 %v102_v2, %s133_s16  ;;  %25 = vrot.lane.b32.xlu1 %v104_v3, %s134_s17  ;;  %s139_s7 = smov 56   ;;  %s140_s8 = smov 48   ;;  %v111_v11 = vld [vmem:[%s207_s0 + $0x5] sm:$0x1]   ;;  %v112_v12 = vld [vmem:[%s207_s0 + $0x4] sm:$0x1]  }
   0x7   :  { %s141_s13 = smov 40   ;;  %s142_s14 = smov 32   ;;  %v113_v13 = vld [vmem:[%s207_s0 + $0x3] sm:$0x1]   ;;  %v114_v14 = vld [vmem:[%s207_s0 + $0x2] sm:$0x1]  }
   0x8   :  { %s143_s19 = smov 24   ;;  %s144_s20 = smov 16   ;;  %v115_v15 = vld [vmem:[%s207_s0 + $0x1] sm:$0x1]   ;;  %vm27_vm4 = vcmask 851712   ;;  %vm33_vm5 = vcmask 786112  }
   0x9   :  { %s145_s0 = smov 8   ;;  %vm39_vm6 = vcmask 720512   ;;  %vm45_vm7 = vcmask 654912   ;;  %vm51_vm8 = vcmask 589312   ;;  %vm57_vm9 = vcmask 523712  }
   0xa   :  { %31 = vrot.lane.b32.xlu0 %v105_v4, %s135_s24  ;;  %37 = vrot.lane.b32.xlu1 %v106_v5, %s136_s25  ;;  %vm63_vm10 = vcmask 458112   ;;  %vm69_vm11 = vcmask 392512   ;;  %vm75_vm12 = vcmask 326912   ;;  %vm81_vm13 = vcmask 261312  }
   0xb   :  { %vm87_vm14 = vcmask 195712   ;;  %vm93_vm15 = vcmask 130112  }
   0xe   :  { %43 = vrot.lane.b32.xlu0 %v107_v7, %s137_s30  ;;  %49 = vrot.lane.b32.xlu1 %v108_v8, %s138_s2 }
  0x12   :  { %55 = vrot.lane.b32.xlu0 %v109_v9, %s139_s7  ;;  %61 = vrot.lane.b32.xlu1 %v110_v10, %s140_s8 }
  0x16   :  { %67 = vrot.lane.b32.xlu0 %v111_v11, %s141_s13  ;;  %73 = vrot.lane.b32.xlu1 %v112_v12, %s142_s14 }
  0x1a   :  { %79 = vrot.lane.b32.xlu0 %v113_v13, %s143_s19  ;;  %85 = vrot.lane.b32.xlu1 %v114_v14, %s144_s20 }
  0x1e   :  { %91 = vrot.lane.b32.xlu0 %v115_v15, %s145_s0 }
  0x74   :  { %v8_v16 = vpop.permute.xlu0 %7   ;;  %v20_v17 = vpop.permute.xlu1 %19  }
  0x75   :  { %10 = vst.msk [vmem:[#allocation0] sm:$0x1] %vm9_vm1, %v8_v16  }
  0x78   :  { %v14_v18 = vpop.permute.xlu0 %13   ;;  %v26_v19 = vpop.permute.xlu1 %25  }
  0x79   :  { %16 = vst.msk [vmem:[#allocation0] sm:$0x1] %vm15_vm2, %v14_v18  }
  0x7a   :  { %22 = vst.msk [vmem:[#allocation0] sm:$0x1] %vm21_vm3, %v20_v17  }
  0x7b   :  { %28 = vst.msk [vmem:[#allocation0] sm:$0x1] %vm27_vm4, %v26_v19  }
  0x7c   :  { %v32_v20 = vpop.permute.xlu0 %31   ;;  %v38_v21 = vpop.permute.xlu1 %37  }
  0x7d   :  { %34 = vst.msk [vmem:[#allocation0] sm:$0x1] %vm33_vm5, %v32_v20  }
  0x7e   :  { %40 = vst.msk [vmem:[#allocation0] sm:$0x1] %vm39_vm6, %v38_v21  }
  0x80   :  { %v44_v22 = vpop.permute.xlu0 %43   ;;  %v50_v23 = vpop.permute.xlu1 %49  }
  0x81   :  { %46 = vst.msk [vmem:[#allocation0] sm:$0x1] %vm45_vm7, %v44_v22  }
  0x82   :  { %52 = vst.msk [vmem:[#allocation0] sm:$0x1] %vm51_vm8, %v50_v23  }
  0x84   :  { %v56_v24 = vpop.permute.xlu0 %55   ;;  %v62_v25 = vpop.permute.xlu1 %61  }
  0x85   :  { %58 = vst.msk [vmem:[#allocation0] sm:$0x1] %vm57_vm9, %v56_v24  }
  0x86   :  { %64 = vst.msk [vmem:[#allocation0] sm:$0x1] %vm63_vm10, %v62_v25  }
  0x88   :  { %v68_v26 = vpop.permute.xlu0 %67   ;;  %v74_v27 = vpop.permute.xlu1 %73  }
  0x89   :  { %70 = vst.msk [vmem:[#allocation0] sm:$0x1] %vm69_vm11, %v68_v26  }
  0x8a   :  { %76 = vst.msk [vmem:[#allocation0] sm:$0x1] %vm75_vm12, %v74_v27  }
  0x8c   :  { %v80_v28 = vpop.permute.xlu0 %79   ;;  %v86_v29 = vpop.permute.xlu1 %85  }
  0x8d   :  { %82 = vst.msk [vmem:[#allocation0] sm:$0x1] %vm81_vm13, %v80_v28  }
  0x8e   :  { %88 = vst.msk [vmem:[#allocation0] sm:$0x1] %vm87_vm14, %v86_v29  }
  0x90   :  { %v92_v30 = vpop.permute.xlu0 %91  }
  0x91   :  { %94 = vst.msk [vmem:[#allocation0] sm:$0x1] %vm93_vm15, %v92_v30  }
  0x98   :  { %v98_v31 = vld [vmem:[#allocation0] sm:$0x1] }
  0x99   :  { %100 = vst [vmem:[%s208_s1] sm:$0x1] %v98_v31 }

// kernel: residual_block_forward.1
= control target key start
LH: loop header
LB: loop body
LE: loop exit
PB: predicated region body
PF: predicated region fallthrough
CT: control target
= control target key end

     0   :  { %s1781_s18 = smov 0   ;;  %s2363_s0 = inlined_call_operand.vmem [shape: bf16[2,72,128], index: 0, kind: input, shape index: {}]   ;;  %s2364_s1 = inlined_call_operand.vmem [shape: bf16[384,128], index: 1, kind: input, shape index: {}]   ;;  %s2365_s2 = inlined_call_operand.vmem [shape: f32[1,128], index: 2, kind: input, shape index: {}]   ;;  %s2366_s3 = inlined_call_operand.vmem [shape: bf16[384,128], index: 3, kind: input, shape index: {}]   ;;  %s2367_s4 = inlined_call_operand.vmem [shape: f32[1,128], index: 4, kind: input, shape index: {}]   ;;  %s2368_s5 = inlined_call_operand.vmem [shape: f32[2,72,128], index: 5, kind: output, shape index: {}]  }
   0x1 LB: > { %s1369_s19 = sadd.s32 4294967295, %s1746_s18   ;;  %p1373_p0 = scmp.ge.s32.totalorder %s1746_s18, 1  ;;  %s1746_s18 = sphi %s1781_s18, %s15_s18  }
   0x2   : > { %p187_p1 = scmp.lt.s32.totalorder %s1746_s18, 3 }
   0x4   : > { %p188_p2 = pnand %p1373_p0, %p187_p1 }
   0x5   : > { %v1683_v0 = vld [vmem:[%s2364_s1 + $0x40] sm:$0xff] (!%p188_p2)   ;;  %v1748_v2 = vmov (!%p188_p2), 0.0   ;;  %v1686_v4 = vld [vmem:[%s2364_s1 + $0x48] sm:$0xff] (!%p188_p2)   ;;  %v1689_v7 = vld [vmem:[%s2364_s1 + $0x50] sm:$0xff] (!%p188_p2)   ;;  %vm2369_vm0 = vmmov (!%p188_p2), 0   ;;  %p215_p3 = scmp.lt.s32.totalorder (!%p188_p2), %s1369_s19, 1 }
   0x6   : > { %191 = sbr.rel (%p188_p2) target bundleno = 524 (0x20c), region = 40  ;;  %v1684_v1 = vld [vmem:[%s2364_s1] sm:$0xff] (!%p188_p2)   ;;  %1580 = vmatprep.subr.bf16.mxu1 (!%p188_p2), %v1748_v2  ;;  %1462 = vmatprep.subr.bf16.mxu0 (!%p188_p2), %v1683_v0  ;;  %v1687_v5 = vld [vmem:[%s2364_s1 + $0x8] sm:$0xff] (!%p188_p2)   ;;  %v1690_v8 = vld [vmem:[%s2364_s1 + $0x10] sm:$0xff] (!%p188_p2)   ;;  %vm434_vm1 = vcmask (!%p188_p2), 1040384   ;;  %vm462_vm2 = vcmask (!%p188_p2), 1046528  }
   0x7   : > { %v1685_v3 = vld [vmem:[%s2364_s1 + $0x80] sm:$0xff] (!%p188_p2)   ;;  %1463 = vmatpush3.bf16.msra.mxu0 (!%p188_p2), %v1684_v1  ;;  %v1688_v6 = vld [vmem:[%s2364_s1 + $0x88] sm:$0xff] (!%p188_p2)   ;;  %1596 = vmatprep.mubr.msk.bf16.mxu1 (!%p188_p2), %vm2369_vm0, %v1748_v2  ;;  %v1691_v9 = vld [vmem:[%s2364_s1 + $0x90] sm:$0xff] (!%p188_p2)   ;;  %vm1750_vm4 = vmmov (!%p188_p2), 1  }
   0x8   : > { %1581 = vmatpush3.bf16.msra.mxu1 (!%p188_p2), %v1685_v3  ;;  %1464 = vmatprep.subr.bf16.mxu0 (!%p188_p2), %v1686_v4  ;;  %v1692_v10 = vld [vmem:[%s2364_s1 + $0x58] sm:$0xff] (!%p188_p2)   ;;  %v1695_v13 = vld [vmem:[%s2364_s1 + $0x60] sm:$0xff] (!%p188_p2)   ;;  %v1698_v16 = vld [vmem:[%s2364_s1 + $0x68] sm:$0xff] (!%p188_p2)  }
   0x9   : > { %1582 = vmatprep.subr.bf16.mxu1 (!%p188_p2), %v1748_v2  ;;  %v1693_v11 = vld [vmem:[%s2364_s1 + $0x18] sm:$0xff] (!%p188_p2)   ;;  %v1696_v14 = vld [vmem:[%s2364_s1 + $0x20] sm:$0xff] (!%p188_p2)   ;;  %v1699_v17 = vld [vmem:[%s2364_s1 + $0x28] sm:$0xff] (!%p188_p2)  }
   0xa   : > { %v1694_v12 = vld [vmem:[%s2364_s1 + $0x98] sm:$0xff] (!%p188_p2)   ;;  %v1697_v15 = vld [vmem:[%s2364_s1 + $0xa0] sm:$0xff] (!%p188_p2)   ;;  %v1700_v18 = vld [vmem:[%s2364_s1 + $0xa8] sm:$0xff] (!%p188_p2)  }
   0xb   : > { %1465 = vmatpush3.bf16.msra.mxu0 (!%p188_p2), %v1687_v5  ;;  %v1701_v19 = vld [vmem:[%s2364_s1 + $0x70] sm:$0xff] (!%p188_p2)   ;;  %v1704_v23 = vld [vmem:[%s2364_s1 + $0x78] sm:$0xff] (!%p188_p2)   ;;  %vm1898_vm3 = vmneg (!%p188_p2), %vm434_vm1 }
   0xc   : > { %1583 = vmatpush3.bf16.msra.mxu1 (!%p188_p2), %v1688_v6  ;;  %1466 = vmatprep.subr.bf16.mxu0 (!%p188_p2), %v1689_v7  ;;  %v1702_v20 = vld [vmem:[%s2364_s1 + $0x30] sm:$0xff] (!%p188_p2)   ;;  %v1705_v29 = vld [vmem:[%s2364_s1 + $0x38] sm:$0xff] (!%p188_p2)   ;;  %v1712_v41 = vld [vmem:[%s2366_s3 + $0x40] sm:$0xff] (!%p188_p2)  }
   0xd   : > { %1584 = vmatprep.subr.bf16.mxu1 %v1748_v2  ;;  %s2405_s19 = smov (!%p215_p3, %s1369_s19), 1  ;;  %v1703_v22 = vld [vmem:[%s2364_s1 + $0xb0] sm:$0xff]   ;;  %v1707_v34 = vld [vmem:[%s2364_s1 + $0xb8] sm:$0xff]   ;;  %vm1920_vm5 = vmpackc.low %vm1750_vm4, %vm1898_vm3 }
   0xe   : > { %s1652_s29 = smul.u32 36, %s2405_s19  ;;  %v1713_v50 = vld [vmem:[%s2366_s3] sm:$0xff]   ;;  %v1714_v52 = vld [vmem:[%s2366_s3 + $0x48] sm:$0xff]   ;;  %v1717_v1 = vld [vmem:[%s2366_s3 + $0x50] sm:$0xff]  }
   0xf   : > { %1467 = vmatpush3.bf16.msra.mxu0 %v1690_v8  ;;  %v1716_v54 = vld [vmem:[%s2366_s3 + $0x80] sm:$0xff]   ;;  %v1715_v61 = vld [vmem:[%s2366_s3 + $0x8] sm:$0xff]   ;;  %v1718_v8 = vld [vmem:[%s2366_s3 + $0x10] sm:$0xff]   ;;  %s1653_s7 = smul.u32 72, %s2405_s19 }
  0x10   : > { %1585 = vmatpush3.bf16.msra.mxu1 %v1691_v9  ;;  %1468 = vmatprep.subr.bf16.mxu0 %v1692_v10  ;;  %s1863_s13 = scalar_lea.vmem %s2363_s0, %s1652_s29  ;;  %v1719_v3 = vld [vmem:[%s2366_s3 + $0x88] sm:$0xff]   ;;  %v1720_v10 = vld [vmem:[%s2366_s3 + $0x58] sm:$0xff]   ;;  %vm2020_vm6 = vmpackc.low %vm462_vm2, %vm462_vm2 }
  0x11   : > { %1586 = vmatprep.subr.bf16.mxu1 %v1748_v2  ;;  %v226_v21 = vld [vmem:[%s1863_s13] sm:$0xff]   ;;  %v228_v26 = vld [vmem:[%s1863_s13 + $0x8] sm:$0xff]   ;;  %v1885_v28 = vld [vmem:[%s1863_s13 + $0x10] sm:$0xff]   ;;  %s2334_s10 = scalar_lea.vmem %s2368_s5, %s1653_s7 }
  0x12   : > { %v1876_v24 = vunpack.c.l.bf16 %v226_v21  ;;  %v1878_v25 = vunpack.c.h.bf16 %v226_v21  ;;  %v1882_v27 = vunpack.c.l.bf16 %v228_v26  ;;  %736 = vmatprep.mubr.bf16.mxu0 %v226_v21  ;;  %v1903_v37 = vunpack.c.h.bf16 %v228_v26  ;;  %v1916_v44 = vld [vmem:[%s1863_s13 + $0x18] sm:$0xff]   ;;  %v234_v7 = vld [vmem:[%s1863_s13 + $0x20] sm:$0xf] }
  0x13   : > { %1469 = vmatpush3.bf16.msra.mxu0 %v1693_v11  ;;  %v1908_v40 = vunpack.c.l.bf16 %v1885_v28  ;;  %v1935_v53 = vunpack.c.h.bf16 %v1885_v28  ;;  %v1946_v57 = vunpack.c.l.bf16 %v1916_v44  ;;  %v1959_v0 = vunpack.c.h.bf16 %v1916_v44 }
  0x14   : > { %1587 = vmatpush3.bf16.msra.mxu1 %v1694_v12  ;;  %1470 = vmatprep.subr.bf16.mxu0 %v1695_v13  ;;  %v435_v30 = vrot.slane %v1876_v24, 7  ;;  %v436_v31 = vrot.slane %v1878_v25, 7  ;;  %v463_v32 = vrot.slane %v1876_v24, 1  ;;  %v464_v33 = vrot.slane %v1878_v25, 1  ;;  %v1722_v12 = vld [vmem:[%s2366_s3 + $0x90] sm:$0xff]   ;;  %v1721_v13 = vld [vmem:[%s2366_s3 + $0x18] sm:$0xff]  }
  0x15   : > { %1588 = vmatprep.subr.bf16.mxu1 %v1748_v2  ;;  %v466_v36 = vrot.slane %v1882_v27, 1  ;;  %v438_v47 = vrot.slane %v1882_v27, 7  ;;  %v440_v48 = vrot.slane %v1903_v37, 7  ;;  %v468_v49 = vrot.slane %v1903_v37, 1 }
  0x16   : > { %v437_v38 = vsel %vm434_vm1, %v435_v30, %v436_v31  ;;  %v465_v39 = vsel %vm462_vm2, %v463_v32, %v464_v33  ;;  %v470_v51 = vrot.slane %v1908_v40, 1  ;;  %v442_v60 = vrot.slane %v1908_v40, 7 }
  0x17   : > { %1471 = vmatpush3.bf16.msra.mxu0 %v1696_v14  ;;  %v467_v42 = vsel %vm462_vm2, %v464_v33, %v466_v36  ;;  %v1408_v43 = vpack.c.bf16 %v437_v38, %v435_v30  ;;  %v439_v55 = vsel %vm434_vm1, %v436_v31, %v438_v47  ;;  %v441_v56 = vsel %vm434_vm1, %v438_v47, %v440_v48  ;;  %v1729_v47 = vld [vmem:[%s2366_s3 + $0x70] sm:$0xff]  }
  0x18   : > { %1589 = vmatpush3.bf16.msra.mxu1 %v1697_v15  ;;  %1472 = vmatprep.subr.bf16.mxu0 %v1698_v16  ;;  %v492_v46 = vpack.c.bf16 %v467_v42, %v465_v39  ;;  %v469_v58 = vsel %vm462_vm2, %v466_v36, %v468_v49  ;;  %v471_v59 = vsel %vm462_vm2, %v468_v49, %v470_v51  ;;  %v444_v62 = vrot.slane %v1935_v53, 7  ;;  %v1723_v16 = vld [vmem:[%s2366_s3 + $0x60] sm:$0xff]   ;;  %v1731_v49 = vld [vmem:[%s2366_s3 + $0xa8] sm:$0xff]  }
  0x19   : > { %1590 = vmatprep.subr.bf16.mxu1 %v1748_v2  ;;  %v472_v63 = vrot.slane %v1935_v53, 1  ;;  %v493_v4 = vpack.c.bf16 %v441_v56, %v439_v55  ;;  %v495_v5 = vpack.c.bf16 %v471_v59, %v469_v58  ;;  %v474_v6 = vrot.slane %v1946_v57, 1 }
  0x1a   : > { %v446_v9 = vrot.slane %v1946_v57, 7  ;;  %v448_v11 = vrot.slane %v1959_v0, 7  ;;  %v443_v14 = vsel %vm434_vm1, %v440_v48, %v442_v60  ;;  %v445_v15 = vsel %vm434_vm1, %v442_v60, %v444_v62  ;;  %v1730_v48 = vld [vmem:[%s2366_s3 + $0x30] sm:$0xff]  }
  0x1b   : > { %1473 = vmatpush3.bf16.msra.mxu0 %v1699_v17  ;;  %v1725_v17 = vld [vmem:[%s2366_s3 + $0x98] sm:$0xff]   ;;  %v496_v21 = vpack.c.bf16 %v445_v15, %v443_v14  ;;  %v1380_v35 = vcombine.low %v234_v7, %v234_v7  ;;  %v244_v55 = vlaneseq }
  0x1c   : > { %1591 = vmatpush3.bf16.msra.mxu1 %v1700_v18  ;;  %1474 = vmatprep.subr.bf16.mxu0 %v1701_v19  ;;  %v473_v18 = vsel %vm462_vm2, %v470_v51, %v472_v63  ;;  %v475_v19 = vsel %vm462_vm2, %v472_v63, %v474_v6  ;;  %v449_v30 = vsel %vm434_vm1, %v446_v9, %v448_v11  ;;  %v1733_v51 = vld [vmem:[%s2366_s3 + $0x38] sm:$0xff]  }
  0x1d   : > { %1592 = vmatprep.subr.bf16.mxu1 %v1748_v2  ;;  %v245_v56 = vshrl.u32 %v244_v55, 7 }
  0x1f   : > { %1475 = vmatpush3.bf16.msra.mxu0 %v1702_v20  ;;  %v1998_v20 = vunpack.c.l.bf16 %v234_v7  ;;  %v246_v58 = vadd.s32 8, %v245_v56  ;;  %v2061_v59 = vmul.u32.u64.low 3817748708, %v245_v56  ;;  %v2062_v60 = vmul.u32.u64.high 3817748708, %v245_v56, %v2061_v59 }
  0x20   : > { %1593 = vmatpush3.bf16.msra.mxu1 %v1703_v22  ;;  %1476 = vmatprep.subr.bf16.mxu0 %v1704_v23  ;;  %v498_v22 = vpack.c.bf16 %v475_v19, %v473_v18  ;;  %v476_v23 = vrot.slane %v1959_v0, 1  ;;  %v247_v63 = vadd.s32 16, %v245_v56  ;;  %v2078_v14 = vadd.s32 40, %v245_v56 }
  0x21   : > { %1594 = vmatprep.subr.bf16.mxu1 %v1748_v2  ;;  %v450_v36 = vrot.slane %v1998_v20, 7 }
  0x22   : > { %v477_v31 = vsel %vm462_vm2, %v474_v6, %v476_v23  ;;  %v249_v6 = vadd.s32 32, %v245_v56 }
  0x23   : > { %1477 = vmatpush3.bf16.msra.mxu0 %v1705_v29  ;;  %v447_v29 = vsel %vm434_vm1, %v444_v62, %v446_v9  ;;  %v451_v38 = vsel %vm434_vm1, %v448_v11, %v450_v36 }
  0x24   : > { %1595 = vmatpush3.bf16.msra.mxu1 %v1707_v34  ;;  %1521 = vmatprep.subr.bf16.mxu0 %v1712_v41  ;;  %v499_v33 = vpack.c.bf16 %v449_v30, %v447_v29  ;;  %v502_v39 = vpack.c.bf16 %v451_v38, %v451_v38  ;;  %v2093_v30 = vadd.s32 56, %v245_v56 }
  0x25   : > { %1616 = vmatprep.subr.bf16.mxu1 %v1748_v2 }
  0x26   : > { %1409 = vmatmul.mubr.msk.bf16.vlgmr.msra.gmra.mrb[0].mxu0 %vm1920_vm5, %v1408_v43  ;;  %v1726_v43 = vld [vmem:[%s2366_s3 + $0x68] sm:$0xff]   ;;  %v2096_v36 = vmul.u32.u64.low 3817748708, %v2093_v30  ;;  %v2097_v38 = vmul.u32.u64.high 3817748708, %v2093_v30, %v2096_v36 }
  0x27   : > { %1597 = vmatmul.mubr.bf16.vlgmr.msra.gmra.mrb[0].mxu1 %v492_v46  ;;  %744 = vmatprep.mubr.bf16.mxu0 %v228_v26  ;;  %v478_v26 = vrot.slane %v1998_v20, 1  ;;  %v1728_v46 = vld [vmem:[%s2366_s3 + $0xa0] sm:$0xff]  }
  0x28   : > { %1600 = vmatprep.mubr.msk.bf16.mxu1 %vm2369_vm0, %v1748_v2  ;;  %1522 = vmatpush3.bf16.msra.mxu0 %v1713_v50  ;;  %v1732_v50 = vld [vmem:[%s2366_s3 + $0x78] sm:$0xff]  }
  0x29   : > { %1523 = vmatprep.subr.bf16.mxu0 %v1714_v52  ;;  %1617 = vmatpush3.bf16.msra.mxu1 %v1716_v54  ;;  %v479_v32 = vsel %vm462_vm2, %v476_v23, %v478_v26  ;;  %v1411_v41 = vpack.c.bf16 %v478_v26, %v478_v26  ;;  %v1734_v52 = vld [vmem:[%s2366_s3 + $0xb0] sm:$0xff]   ;;  %v1735_v54 = vld [vmem:[%s2366_s3 + $0xb8] sm:$0xff]  }
  0x2a   : > { %1618 = vmatprep.subr.bf16.mxu1 %v1748_v2  ;;  %v501_v34 = vpack.c.bf16 %v479_v32, %v477_v31 }
  0x2c   : > { %1524 = vmatpush3.bf16.msra.mxu0 %v1715_v61  ;;  %v2064_v61 = vmul.u32.u64.low 3817748708, %v246_v58  ;;  %v2065_v62 = vmul.u32.u64.high 3817748708, %v246_v58, %v2064_v61 }
  0x2d   : > { %1525 = vmatprep.subr.bf16.mxu0 %v1717_v1  ;;  %1619 = vmatpush3.bf16.msra.mxu1 %v1719_v3  ;;  %v248_v1 = vadd.s32 24, %v245_v56  ;;  %v260_v3 = vshrl.u32 %v2062_v60, 4 }
  0x2e   : > { %745 = vmatmul.mubr.bf16.gmra.mrb[4].mxu0 %v493_v4  ;;  %1620 = vmatprep.subr.bf16.mxu1 %v1748_v2  ;;  %v271_v7 = vshrl.u32 %v2065_v62, 4 }
  0x2f   : > { %1601 = vmatmul.mubr.bf16.gmra.mrb[4].mxu1 %v495_v5  ;;  %752 = vmatprep.mubr.bf16.mxu0 %v1885_v28  ;;  %v1724_v28 = vld [vmem:[%s2366_s3 + $0x20] sm:$0xff]   ;;  %v2068_v4 = vmul.u32.u64.low 3817748708, %v247_v63  ;;  %v2069_v5 = vmul.u32.u64.high 3817748708, %v247_v63, %v2068_v4 }
  0x30   : > { %1604 = vmatprep.mubr.msk.bf16.mxu1 %vm2369_vm0, %v1748_v2  ;;  %1526 = vmatpush3.bf16.msra.mxu0 %v1718_v8  ;;  %v2072_v8 = vmul.u32.u64.low 3817748708, %v248_v1  ;;  %v2073_v9 = vmul.u32.u64.high 3817748708, %v248_v1, %v2072_v8 }
  0x31   : > { %1527 = vmatprep.subr.bf16.mxu0 %v1720_v10  ;;  %1621 = vmatpush3.bf16.msra.mxu1 %v1722_v12  ;;  %v261_v10 = vmul.u32 18, %v260_v3  ;;  %v2075_v11 = vmul.u32.u64.low 3817748708, %v249_v6  ;;  %v2076_v12 = vmul.u32.u64.high 3817748708, %v249_v6, %v2075_v11  ;;  %v337_v3 = vshrl.u32 %v2097_v38, 4 }
  0x32   : > { %1622 = vmatprep.subr.bf16.mxu1 %v1748_v2  ;;  %v293_v19 = vshrl.u32 %v2073_v9, 4 }
  0x33   : > { %v262_v15 = vsub.s32 %v245_v56, %v261_v10  ;;  %v304_v26 = vshrl.u32 %v2076_v12, 4 }
  0x34   : > { %1528 = vmatpush3.bf16.msra.mxu0 %v1721_v13  ;;  %v272_v13 = vmul.u32 18, %v271_v7  ;;  %v294_v31 = vmul.u32 18, %v293_v19 }
  0x35   : > { %1529 = vmatprep.subr.bf16.mxu0 %v1723_v16  ;;  %1623 = vmatpush3.bf16.msra.mxu1 %v1725_v17  ;;  %v282_v16 = vshrl.u32 %v2069_v5, 4  ;;  %v2081_v17 = vadd.s32 48, %v245_v56  ;;  %vm353_vm7 = vcmp.ne.s32.totalorder %v262_v15, 0  ;;  %vm362_vm8 = vcmp.lt.s32.totalorder %v262_v15, 0 }
  0x36   : > { %753 = vmatmul.mubr.bf16.gmra.mrb[8].mxu0 %v496_v21  ;;  %1624 = vmatprep.subr.bf16.mxu1 %v1748_v2  ;;  %v273_v18 = vsub.s32 %v246_v58, %v272_v13  ;;  %v380_v32 = vadd.s32 18, %v262_v15  ;;  %vm371_vm11 = vmand %vm362_vm8, %vm353_vm7 }
  0x37   : > { %1605 = vmatmul.mubr.bf16.gmra.mrb[8].mxu1 %v498_v22  ;;  %760 = vmatprep.mubr.bf16.mxu0 %v1916_v44  ;;  %v1727_v44 = vld [vmem:[%s2366_s3 + $0x28] sm:$0xff]   ;;  %v2085_v21 = vmul.u32.u64.low 3817748708, %v2078_v14  ;;  %v2086_v22 = vmul.u32.u64.high 3817748708, %v2078_v14, %v2085_v21  ;;  %v283_v23 = vmul.u32 18, %v282_v16 }
  0x38   : > { %1608 = vmatprep.mubr.msk.bf16.mxu1 %vm2369_vm0, %v1748_v2  ;;  %1530 = vmatpush3.bf16.msra.mxu0 %v1724_v28  ;;  %v2090_v28 = vmul.u32.u64.low 3817748708, %v2081_v17  ;;  %v2091_v29 = vmul.u32.u64.high 3817748708, %v2081_v17, %v2090_v28  ;;  %vm354_vm9 = vcmp.ne.s32.totalorder %v273_v18, 0  ;;  %vm363_vm10 = vcmp.lt.s32.totalorder %v273_v18, 0 }
  0x39   : > { %1531 = vmatprep.subr.bf16.mxu0 %v1726_v43  ;;  %1625 = vmatpush3.bf16.msra.mxu1 %v1728_v46  ;;  %vm372_vm12 = vmand %vm363_vm10, %vm354_vm9  ;;  %v389_v43 = vsel %vm371_vm11, %v380_v32, %v262_v15  ;;  %v338_v21 = vmul.u32 18, %v337_v3 }
  0x3a   : > { %1626 = vmatprep.subr.bf16.mxu1 %v1748_v2  ;;  %vm398_vm4 = vcmp.ne.s32.totalorder %v389_v43, 0  ;;  %vm407_vm7 = vcmp.ne.s32.totalorder %v389_v43, 17 }
  0x3b   : > { %v2166_v43 = vsub.s32 %v2093_v30, %v338_v21 }
  0x3c   : > { %1532 = vmatpush3.bf16.msra.mxu0 %v1727_v44 }
  0x3d   : > { %1533 = vmatprep.subr.bf16.mxu0 %v1729_v47  ;;  %1627 = vmatpush3.bf16.msra.mxu1 %v1731_v49  ;;  %v2103_v47 = vld [vmem:[%s2365_s2] ss:$0 sm:$0xff]  ;;  %v2106_v49 = vadd.s32 64, %v245_v56 }
  0x3e   : > { %761 = vmatmul.mubr.bf16.gmra.mrb[12].mxu0 %v499_v33  ;;  %1628 = vmatprep.subr.bf16.mxu1 %v1748_v2  ;;  %v381_v33 = vadd.s32 18, %v273_v18 }
  0x3f   : > { %1609 = vmatmul.mubr.bf16.gmra.mrb[12].mxu1 %v501_v34  ;;  %768 = vmatprep.mubr.bf16.mxu0 %v1380_v35  ;;  %v284_v34 = vsub.s32 %v247_v63, %v283_v23  ;;  %v305_v35 = vmul.u32 18, %v304_v26  ;;  %v2118_v4 = vmul.u32.u64.low 3817748708, %v2106_v49  ;;  %v2119_v5 = vmul.u32.u64.high 3817748708, %v2106_v49, %v2118_v4 }
  0x40   : > { %1612 = vmatprep.mubr.msk.bf16.mxu1 %vm2369_vm0, %v1748_v2  ;;  %1534 = vmatpush3.bf16.msra.mxu0 %v1730_v48  ;;  %v390_v44 = vsel %vm372_vm12, %v381_v33, %v273_v18  ;;  %v326_v48 = vshrl.u32 %v2091_v29, 4 }
  0x41   : > { %1535 = vmatprep.subr.bf16.mxu0 %v1732_v50  ;;  %1629 = vmatpush3.bf16.msra.mxu1 %v1734_v52  ;;  %vm355_vm13 = vcmp.ne.s32.totalorder %v284_v34, 0  ;;  %vm364_vm14 = vcmp.lt.s32.totalorder %v284_v34, 0  ;;  %v306_v46 = vsub.s32 %v249_v6, %v305_v35  ;;  %vm399_vm8 = vcmp.ne.s32.totalorder %v390_v44, 0 }
  0x42   : > { %1630 = vmatprep.subr.bf16.mxu1 %v1748_v2  ;;  %vm408_vm9 = vcmp.ne.s32.totalorder %v390_v44, 17  ;;  %vm2110_vm10 = vmand %vm364_vm14, %vm355_vm13  ;;  %v348_v44 = vshrl.u32 %v2119_v5, 4 }
  0x43   : > { %vm357_vm11 = vcmp.ne.s32.totalorder %v306_v46, 0  ;;  %vm366_vm12 = vcmp.lt.s32.totalorder %v306_v46, 0  ;;  %vm2127_vm13 = vmand %vm398_vm4, %vm407_vm7  ;;  %v384_v12 = vadd.s32 18, %v306_v46 }
  0x44   : > { %1536 = vmatpush3.bf16.msra.mxu0 %v1733_v51  ;;  %v382_v51 = vadd.s32 18, %v284_v34  ;;  %vm2134_vm14 = vmand %vm366_vm12, %vm357_vm11  ;;  %v349_v4 = vmul.u32 18, %v348_v44 }
  0x45   : > { %1631 = vmatpush3.bf16.msra.mxu1 %v1735_v54 }
  0x46   : > { %769 = vmatmul.mubr.bf16.gmra.mrb[16].mxu0 %v502_v39  ;;  %v295_v39 = vsub.s32 %v248_v1, %v294_v31  ;;  %v327_v1 = vmul.u32 18, %v326_v48  ;;  %v391_v9 = vsel %vm2110_vm10, %v382_v51, %v284_v34  ;;  %v2149_v31 = vsel %vm2134_vm14, %v384_v12, %v306_v46 }
  0x47   : > { %1613 = vmatmul.mubr.msk.bf16.gmra.mrb[16].mxu1 %vm2020_vm6, %v1411_v41  ;;  %v315_v41 = vshrl.u32 %v2086_v22, 4  ;;  %vm409_vm7 = vcmp.ne.s32.totalorder %v391_v9, 17  ;;  %v2224_v45 = vsub.s32 %v2106_v49, %v349_v4 }
  0x48   : > { %1632 = vmatprep.mubr.msk.bf16.mxu1 %vm2369_vm0, %v1748_v2  ;;  %vm356_vm15 = vcmp.ne.s32.totalorder %v295_v39, 0  ;;  %vm365_vm3 = vcmp.lt.s32.totalorder %v295_v39, 0  ;;  %v383_v61 = vadd.s32 18, %v295_v39  ;;  %v2145_v19 = vsub.s32 %v2081_v17, %v327_v1 }
  0x49   : > { %v316_v52 = vmul.u32 18, %v315_v41  ;;  %vm374_vm0 = vmand %vm365_vm3, %vm356_vm15  ;;  %vm400_vm3 = vcmp.ne.s32.totalorder %v391_v9, 0  ;;  %v388_v4 = vadd.s32 18, %v2224_v45 }
  0x4a   : > { %v392_v16 = vsel %vm374_vm0, %v383_v61, %v295_v39  ;;  %vm2140_vm15 = vmand %vm399_vm8, %vm408_vm9  ;;  %vm359_vm12 = vcmp.ne.s32.totalorder %v2145_v19, 0  ;;  %vm368_vm14 = vcmp.lt.s32.totalorder %v2145_v19, 0 }
  0x4b   : > { %v317_v10 = vsub.s32 %v2078_v14, %v316_v52  ;;  %vm401_vm10 = vcmp.ne.s32.totalorder %v392_v16, 0  ;;  %vm410_vm11 = vcmp.ne.s32.totalorder %v392_v16, 17  ;;  %vm1438_vm8 = vmpackc.low %vm2140_vm15, %vm2127_vm13  ;;  %v387_v14 = vadd.s32 18, %v2166_v43 }
  0x4d   : > { %vm358_vm0 = vcmp.ne.s32.totalorder %v317_v10, 0  ;;  %vm367_vm4 = vcmp.lt.s32.totalorder %v317_v10, 0  ;;  %v385_v36 = vadd.s32 18, %v317_v10 }
  0x4e   : > { %vm2159_vm9 = vmand %vm367_vm4, %vm358_vm0  ;;  %vm360_vm4 = vcmp.ne.s32.totalorder %v2166_v43, 0 }
  0x4f   : > { %vm2174_vm0 = vmand %vm400_vm3, %vm409_vm7  ;;  %v394_v61 = vsel %vm2159_vm9, %v385_v36, %v317_v10  ;;  %vm402_vm7 = vcmp.ne.s32.totalorder %v2149_v31, 0 }
  0x50   : > { %vm2191_vm3 = vmand %vm401_vm10, %vm410_vm11  ;;  %vm411_vm10 = vcmp.ne.s32.totalorder %v2149_v31, 17  ;;  %vm403_vm11 = vcmp.ne.s32.totalorder %v394_v61, 0 }
  0x51   : > { %vm1445_vm9 = vmpackc.low %vm2191_vm3, %vm2174_vm0 }
  0xf9   : > { %v1478_v50 = vpop.f32.mrb[0].mxu0 }
  0xfa   : > { %v1479_v54 = vpop.f32.mrb[1].mxu0  ;;  %v810_v55 = vpop.f32.mrb[0].mxu1 }
  0xfb   : > { %v1480_v59 = vadd.f32 %v1479_v54, %v1478_v50  ;;  %v1481_v56 = vpop.f32.mrb[2].mxu0  ;;  %v1598_v60 = vpop.f32.mrb[1].mxu1 }
  0xfc   : > { %v1482_v62 = vpop.f32.mrb[3].mxu0  ;;  %v813_v63 = vpop.f32.mrb[2].mxu1 }
  0xfd   : > { %v739_v6 = vadd.f32 %v1480_v59, %v2103_v47  ;;  %v1483_v7 = vadd.f32 %v1482_v62, %v1481_v56  ;;  %v1599_v8 = vpop.f32.mrb[3].mxu1  ;;  %v386_v62 = vadd.s32 18, %v2145_v19 }
  0xff   : > { %v811_v13 = vadd.f32 %v810_v55, %v739_v6  ;;  %v742_v15 = vadd.f32 %v1483_v7, %v2103_v47 }
 0x101   : > { %v848_v22 = vmax.f32 %v811_v13, 0.0  ;;  %v814_v23 = vadd.f32 %v813_v63, %v742_v15  ;;  %v1484_v26 = vpop.f32.mrb[4].mxu0 }
 0x102   : > { %v1485_v28 = vpop.f32.mrb[5].mxu0  ;;  %v818_v29 = vpop.f32.mrb[4].mxu1 }
 0x103   : > { %v857_v32 = vsel %vm2127_vm13, %v848_v22, 0.0  ;;  %v849_v17 = vmax.f32 %v814_v23, 0.0  ;;  %v1486_v33 = vadd.f32 %v1485_v28, %v1484_v26  ;;  %v1487_v34 = vpop.f32.mrb[6].mxu0  ;;  %v1602_v35 = vpop.f32.mrb[5].mxu1  ;;  %vm2200_vm13 = vmand %vm368_vm14, %vm359_vm12 }
 0x104   : > { %v1488_v38 = vpop.f32.mrb[7].mxu0  ;;  %v821_v39 = vpop.f32.mrb[6].mxu1  ;;  %v875_v54 = vrot.slane %v857_v32, 7  ;;  %v902_v55 = vrot.slane %v857_v32, 1  ;;  %v395_v28 = vsel %vm2200_vm13, %v386_v62, %v2145_v19  ;;  %vm2242_vm12 = vmand %vm402_vm7, %vm411_vm10  ;;  %vm2397_vm13 = vmmov 0  }
 0x105   : > { %v858_v46 = vsel %vm2140_vm15, %v849_v17, 0.0  ;;  %v1439_v48 = vpack.c.bf16 %v849_v17, %v848_v22  ;;  %v747_v50 = vadd.f32 %v1486_v33, %v2103_v47  ;;  %v1489_v51 = vadd.f32 %v1488_v38, %v1487_v34  ;;  %v1603_v52 = vpop.f32.mrb[7].mxu1 }
 0x106   : > { %v876_v58 = vrot.slane %v858_v46, 7  ;;  %v903_v59 = vrot.slane %v858_v46, 1  ;;  %vm369_vm15 = vcmp.lt.s32.totalorder %v2166_v43, 0  ;;  %vm370_vm7 = vcmp.lt.s32.totalorder %v2224_v45, 0 }
 0x107   : > { %v819_v30 = vadd.f32 %v818_v29, %v747_v50  ;;  %v750_v60 = vadd.f32 %v1489_v51, %v2103_v47  ;;  %1440 = vmatprep.mubr.msk.bf16.mxu0 %vm1438_vm8, %v1439_v48  ;;  %vm412_vm8 = vcmp.ne.s32.totalorder %v394_v61, 17 }
 0x108   : > { %v877_v63 = vsel %vm434_vm1, %v875_v54, %v876_v58  ;;  %v904_v1 = vsel %vm462_vm2, %v902_v55, %v903_v59  ;;  %vm2250_vm14 = vmand %vm403_vm11, %vm412_vm8 }
 0x109   : > { %v1443_v5 = vpack.c.bf16 %v877_v63, %v875_v54  ;;  %v850_v6 = vmax.f32 %v819_v30, 0.0  ;;  %v822_v7 = vadd.f32 %v821_v39, %v750_v60  ;;  %v1490_v8 = vpop.f32.mrb[8].mxu0  ;;  %vm1448_vm11 = vmpackc.low %vm2250_vm14, %vm2242_vm12 }
 0x10a   : > { %v1491_v10 = vpop.f32.mrb[9].mxu0  ;;  %v826_v11 = vpop.f32.mrb[8].mxu1 }
 0x10b   : > { %v859_v12 = vsel %vm2174_vm0, %v850_v6, 0.0  ;;  %v851_v13 = vmax.f32 %v822_v7, 0.0  ;;  %v1492_v15 = vadd.f32 %v1491_v10, %v1490_v8  ;;  %v1493_v16 = vpop.f32.mrb[10].mxu0  ;;  %1444 = vmatmul.mubr.msk.bf16.vlgmr.msra.gmra.mrb[20].mxu0 %vm1920_vm5, %v1443_v5  ;;  %v1606_v18 = vpop.f32.mrb[9].mxu1  ;;  %vm378_vm5 = vmand %vm369_vm15, %vm360_vm4  ;;  %vm404_vm0 = vcmp.ne.s32.totalorder %v395_v28, 0 }
 0x10c   : > { %v878_v21 = vrot.slane %v859_v12, 7  ;;  %v905_v22 = vrot.slane %v859_v12, 1  ;;  %v1494_v23 = vpop.f32.mrb[11].mxu0  ;;  %v829_v26 = vpop.f32.mrb[10].mxu1  ;;  %v396_v49 = vsel %vm378_vm5, %v387_v14, %v2166_v43  ;;  %vm361_vm15 = vcmp.ne.s32.totalorder %v2224_v45, 0 }
 0x10d   : > { %v860_v29 = vsel %vm2191_vm3, %v851_v13, 0.0  ;;  %v1446_v32 = vpack.c.bf16 %v851_v13, %v850_v6  ;;  %v755_v17 = vadd.f32 %v1492_v15, %v2103_v47  ;;  %v1495_v33 = vadd.f32 %v1494_v23, %v1493_v16  ;;  %v1607_v34 = vpop.f32.mrb[11].mxu1  ;;  %vm379_vm8 = vmand %vm370_vm7, %vm361_vm15 }
 0x10e   : > { %v906_v35 = vsel %vm462_vm2, %v903_v59, %v905_v22  ;;  %v880_v36 = vrot.slane %v860_v29, 7  ;;  %v907_v19 = vrot.slane %v860_v29, 1  ;;  %v879_v38 = vsel %vm434_vm1, %v876_v58, %v878_v21 }
 0x10f   : > { %v931_v39 = vpack.c.bf16 %v906_v35, %v904_v1  ;;  %v827_v41 = vadd.f32 %v826_v11, %v755_v17  ;;  %v758_v44 = vadd.f32 %v1495_v33, %v2103_v47  ;;  %1447 = vmatprep.mubr.msk.bf16.mxu0 %vm1445_vm9, %v1446_v32  ;;  %vm413_vm3 = vcmp.ne.s32.totalorder %v395_v28, 17 }
 0x110   : > { %v881_v48 = vsel %vm434_vm1, %v878_v21, %v880_v36  ;;  %v908_v50 = vsel %vm462_vm2, %v905_v22, %v907_v19  ;;  %vm405_vm4 = vcmp.ne.s32.totalorder %v396_v49, 0  ;;  %vm414_vm10 = vcmp.ne.s32.totalorder %v396_v49, 17  ;;  %vm2277_vm9 = vmand %vm404_vm0, %vm413_vm3 }
 0x111   : > { %v852_v51 = vmax.f32 %v827_v41, 0.0  ;;  %v830_v43 = vadd.f32 %v829_v26, %v758_v44  ;;  %v1496_v54 = vpop.f32.mrb[12].mxu0  ;;  %1633 = vmatmul.mubr.bf16.vlgmr.msra.gmra.mrb[20].mxu1 %v931_v39  ;;  %v932_v55 = vpack.c.bf16 %v881_v48, %v879_v38  ;;  %vm2285_vm5 = vmand %vm405_vm4, %vm414_vm10  ;;  %v397_v28 = vsel %vm379_vm8, %v388_v4, %v2224_v45 }
 0x112   : > { %v1497_v31 = vpop.f32.mrb[13].mxu0  ;;  %v834_v58 = vpop.f32.mrb[12].mxu1  ;;  %1636 = vmatprep.mubr.msk.bf16.mxu1 %vm2397_vm13, %v1748_v2  ;;  %vm1451_vm0 = vmpackc.low %vm2285_vm5, %vm2277_vm9 }
 0x113   : > { %v861_v59 = vsel %vm2242_vm12, %v852_v51, 0.0  ;;  %v853_v56 = vmax.f32 %v830_v43, 0.0  ;;  %v1498_v30 = vadd.f32 %v1497_v31, %v1496_v54  ;;  %v1499_v60 = vpop.f32.mrb[14].mxu0  ;;  %1184 = vmatmul.mubr.bf16.gmra.mrb[24].mxu0 %v932_v55  ;;  %v1610_v61 = vpop.f32.mrb[13].mxu1  ;;  %vm406_vm12 = vcmp.ne.s32.totalorder %v397_v28, 0 }
 0x114   : > { %v882_v62 = vrot.slane %v861_v59, 7  ;;  %v909_v63 = vrot.slane %v861_v59, 1  ;;  %v1500_v1 = vpop.f32.mrb[15].mxu0  ;;  %v837_v3 = vpop.f32.mrb[14].mxu1 }
 0x115   : > { %v862_v5 = vsel %vm2250_vm14, %v853_v56, 0.0  ;;  %v1449_v6 = vpack.c.bf16 %v853_v56, %v852_v51  ;;  %v763_v7 = vadd.f32 %v1498_v30, %v2103_v47  ;;  %v1501_v8 = vadd.f32 %v1500_v1, %v1499_v60  ;;  %v1611_v9 = vpop.f32.mrb[15].mxu1 }
 0x116   : > { %v884_v10 = vrot.slane %v862_v5, 7  ;;  %v911_v11 = vrot.slane %v862_v5, 1  ;;  %v910_v12 = vsel %vm462_vm2, %v907_v19, %v909_v63  ;;  %v883_v13 = vsel %vm434_vm1, %v880_v36, %v882_v62 }
 0x117   : > { %v835_v15 = vadd.f32 %v834_v58, %v763_v7  ;;  %v766_v16 = vadd.f32 %v1501_v8, %v2103_v47  ;;  %1450 = vmatprep.mubr.msk.bf16.mxu0 %vm1448_vm11, %v1449_v6  ;;  %v934_v18 = vpack.c.bf16 %v910_v12, %v908_v50  ;;  %vm415_vm14 = vcmp.ne.s32.totalorder %v397_v28, 17 }
 0x118   : > { %v885_v21 = vsel %vm434_vm1, %v882_v62, %v884_v10  ;;  %v912_v22 = vsel %vm462_vm2, %v909_v63, %v911_v11  ;;  %vm2303_vm3 = vmand %vm406_vm12, %vm415_vm14 }
 0x119   : > { %v854_v23 = vmax.f32 %v835_v15, 0.0  ;;  %v838_v29 = vadd.f32 %v837_v3, %v766_v16  ;;  %v1502_v32 = vpop.f32.mrb[16].mxu0  ;;  %1637 = vmatmul.mubr.bf16.gmra.mrb[24].mxu1 %v934_v18  ;;  %v935_v17 = vpack.c.bf16 %v885_v21, %v883_v13  ;;  %vm1454_vm4 = vmpackc.low %vm2303_vm3, %vm2303_vm3 }
 0x11a   : > { %v1503_v33 = vpop.f32.mrb[17].mxu0  ;;  %v842_v34 = vpop.f32.mrb[16].mxu1  ;;  %1640 = vmatprep.mubr.msk.bf16.mxu1 %vm2397_vm13, %v1748_v2 }
 0x11b   : > { %v863_v35 = vsel %vm2277_vm9, %v854_v23, 0.0  ;;  %v855_v36 = vmax.f32 %v838_v29, 0.0  ;;  %v1504_v19 = vadd.f32 %v1503_v33, %v1502_v32  ;;  %v1505_v38 = vpop.f32.mrb[18].mxu0  ;;  %1192 = vmatmul.mubr.bf16.gmra.mrb[28].mxu0 %v935_v17  ;;  %v1614_v39 = vpop.f32.mrb[17].mxu1 }
 0x11c   : > { %v886_v41 = vrot.slane %v863_v35, 7  ;;  %v913_v44 = vrot.slane %v863_v35, 1  ;;  %v1506_v49 = vpop.f32.mrb[19].mxu0  ;;  %v845_v45 = vpop.f32.mrb[18].mxu1 }
 0x11d   : > { %v864_v46 = vsel %vm2285_vm5, %v855_v36, 0.0  ;;  %v1452_v48 = vpack.c.bf16 %v855_v36, %v854_v23  ;;  %v771_v50 = vadd.f32 %v1504_v19, %v2103_v47  ;;  %v1615_v51 = vpop.f32.mrb[19].mxu1 }
 0x11e   : > { %v888_v52 = vrot.slane %v864_v46, 7  ;;  %v915_v43 = vrot.slane %v864_v46, 1  ;;  %v914_v54 = vsel %vm462_vm2, %v911_v11, %v913_v44  ;;  %v887_v55 = vsel %vm434_vm1, %v884_v10, %v886_v41  ;;  %v2325_v10 = vld [vmem:[%s2367_s4] ss:$0 sm:$0xff] }
 0x11f   : > { %v843_v58 = vadd.f32 %v842_v34, %v771_v50  ;;  %1453 = vmatprep.mubr.msk.bf16.mxu0 %vm1451_vm0, %v1452_v48  ;;  %v937_v59 = vpack.c.bf16 %v914_v54, %v912_v22 }
 0x120   : > { %v889_v56 = vsel %vm434_vm1, %v886_v41, %v888_v52  ;;  %v916_v30 = vsel %vm462_vm2, %v913_v44, %v915_v43 }
 0x121   : > { %v856_v60 = vmax.f32 %v843_v58, 0.0  ;;  %1641 = vmatmul.mubr.bf16.gmra.mrb[28].mxu1 %v937_v59  ;;  %v938_v47 = vpack.c.bf16 %v889_v56, %v887_v55 }
 0x122   : > { %1644 = vmatprep.mubr.msk.bf16.mxu1 %vm2397_vm13, %v1748_v2 }
 0x123   : > { %v865_v61 = vsel %vm2303_vm3, %v856_v60, 0.0  ;;  %v1455_v62 = vpack.c.bf16 %v856_v60, %v856_v60  ;;  %1200 = vmatmul.mubr.bf16.gmra.mrb[32].mxu0 %v938_v47 }
 0x124   : > { %v890_v63 = vrot.slane %v865_v61, 7  ;;  %v917_v1 = vrot.slane %v865_v61, 1 }
 0x125   : > { %1456 = vmatprep.mubr.msk.bf16.mxu0 %vm1454_vm4, %v1455_v62 }
 0x126   : > { %v918_v3 = vsel %vm462_vm2, %v915_v43, %v917_v1  ;;  %v891_v4 = vsel %vm434_vm1, %v888_v52, %v890_v63  ;;  %v1458_v7 = vpack.c.bf16 %v917_v1, %v917_v1 }
 0x127   : > { %v940_v5 = vpack.c.bf16 %v918_v3, %v916_v30  ;;  %v941_v6 = vpack.c.bf16 %v891_v4, %v891_v4 }
 0x129   : > { %1645 = vmatmul.mubr.bf16.gmra.mrb[32].mxu1 %v940_v5 }
 0x12a   : > { %1648 = vmatprep.mubr.msk.bf16.mxu1 %vm2397_vm13, %v1748_v2 }
 0x12b   : > { %1208 = vmatmul.mubr.bf16.gmra.mrb[36].mxu0 %v941_v6 }
 0x131   : > { %1649 = vmatmul.mubr.msk.bf16.gmra.mrb[36].mxu1 %vm2020_vm6, %v1458_v7 }
 0x1de   : > { %v1537_v8 = vpop.f32.mrb[20].mxu0 }
 0x1df   : > { %v1538_v9 = vpop.f32.mrb[21].mxu0 }
 0x1e0   : > { %v1539_v11 = vadd.f32 %v1538_v9, %v1537_v8  ;;  %v1540_v12 = vpop.f32.mrb[22].mxu0 }
 0x1e1   : > { %v1541_v13 = vpop.f32.mrb[23].mxu0 }
 0x1e2   : > { %v1542_v15 = vadd.f32 %v1541_v13, %v1540_v12  ;;  %v1178_v16 = vadd.f32 %v1539_v11, %v2325_v10 }
 0x1e4   : > { %v1249_v2 = vpop.f32.mrb[20].mxu1  ;;  %v1181_v18 = vadd.f32 %v1542_v15, %v2325_v10 }
 0x1e5   : > { %v1250_v14 = vadd.f32 %v1249_v2, %v1178_v16  ;;  %v1634_v42 = vpop.f32.mrb[21].mxu1 }
 0x1e6   : > { %v1543_v21 = vpop.f32.mrb[24].mxu0  ;;  %v1252_v22 = vpop.f32.mrb[22].mxu1 }
 0x1e7   : > { %v1287_v23 = vadd.f32 %v1250_v14, %v1876_v24  ;;  %v1253_v26 = vadd.f32 %v1252_v22, %v1181_v18  ;;  %v1544_v29 = vpop.f32.mrb[25].mxu0  ;;  %v1635_v32 = vpop.f32.mrb[23].mxu1 }
 0x1e8   : > { %v1545_v28 = vadd.f32 %v1544_v29, %v1543_v21  ;;  %v1546_v17 = vpop.f32.mrb[26].mxu0 }
 0x1e9   : > { %v1296_v33 = vmax.f32 %v1287_v23, 0.0  ;;  %v1288_v34 = vadd.f32 %v1253_v26, %v1878_v25  ;;  %v1547_v35 = vpop.f32.mrb[27].mxu0 }
 0x1ea   : > { %v1548_v36 = vadd.f32 %v1547_v35, %v1546_v17  ;;  %v1186_v19 = vadd.f32 %v1545_v28, %v2325_v10 }
 0x1eb   : > { %1305 = vst [vmem:[%s2334_s10] sm:$0xff] %v1296_v33  ;;  %v1297_v24 = vmax.f32 %v1288_v34, 0.0 }
 0x1ec   : > { %v1257_v38 = vpop.f32.mrb[24].mxu1  ;;  %v1189_v39 = vadd.f32 %v1548_v36, %v2325_v10 }
 0x1ed   : > { %1306 = vst [vmem:[%s2334_s10 + $0x8] sm:$0xff] %v1297_v24  ;;  %v1258_v41 = vadd.f32 %v1257_v38, %v1186_v19  ;;  %v1638_v44 = vpop.f32.mrb[25].mxu1 }
 0x1ee   : > { %v1549_v49 = vpop.f32.mrb[28].mxu0  ;;  %v1260_v45 = vpop.f32.mrb[26].mxu1 }
 0x1ef   : > { %v1289_v46 = vadd.f32 %v1258_v41, %v1882_v27  ;;  %v1261_v48 = vadd.f32 %v1260_v45, %v1189_v39  ;;  %v1550_v25 = vpop.f32.mrb[29].mxu0  ;;  %v1639_v50 = vpop.f32.mrb[27].mxu1 }
 0x1f0   : > { %v1551_v51 = vadd.f32 %v1550_v25, %v1549_v49  ;;  %v1552_v52 = vpop.f32.mrb[30].mxu0 }
 0x1f1   : > { %v1298_v43 = vmax.f32 %v1289_v46, 0.0  ;;  %v1290_v54 = vadd.f32 %v1261_v48, %v1903_v37  ;;  %v1553_v55 = vpop.f32.mrb[31].mxu0 }
 0x1f2   : > { %v1554_v31 = vadd.f32 %v1553_v55, %v1552_v52  ;;  %v1194_v58 = vadd.f32 %v1551_v51, %v2325_v10 }
 0x1f3   : > { %1307 = vst [vmem:[%s2334_s10 + $0x10] sm:$0xff] %v1298_v43  ;;  %v1299_v59 = vmax.f32 %v1290_v54, 0.0 }
 0x1f4   : > { %v1265_v56 = vpop.f32.mrb[28].mxu1  ;;  %v1197_v30 = vadd.f32 %v1554_v31, %v2325_v10 }
 0x1f5   : > { %1308 = vst [vmem:[%s2334_s10 + $0x18] sm:$0xff] %v1299_v59  ;;  %v1266_v27 = vadd.f32 %v1265_v56, %v1194_v58  ;;  %v1642_v60 = vpop.f32.mrb[29].mxu1 }
 0x1f6   : > { %v1555_v47 = vpop.f32.mrb[32].mxu0  ;;  %v1268_v61 = vpop.f32.mrb[30].mxu1 }
 0x1f7   : > { %v1291_v62 = vadd.f32 %v1266_v27, %v1908_v40  ;;  %v1269_v63 = vadd.f32 %v1268_v61, %v1197_v30  ;;  %v1556_v37 = vpop.f32.mrb[33].mxu0  ;;  %v1643_v1 = vpop.f32.mrb[31].mxu1 }
 0x1f8   : > { %v1557_v3 = vadd.f32 %v1556_v37, %v1555_v47  ;;  %v1558_v4 = vpop.f32.mrb[34].mxu0 }
 0x1f9   : > { %v1300_v5 = vmax.f32 %v1291_v62, 0.0  ;;  %v1292_v6 = vadd.f32 %v1269_v63, %v1935_v53  ;;  %v1559_v7 = vpop.f32.mrb[35].mxu0 }
 0x1fa   : > { %v1560_v8 = vadd.f32 %v1559_v7, %v1558_v4  ;;  %v1202_v9 = vadd.f32 %v1557_v3, %v2325_v10 }
 0x1fb   : > { %1309 = vst [vmem:[%s2334_s10 + $0x20] sm:$0xff] %v1300_v5  ;;  %v1301_v11 = vmax.f32 %v1292_v6, 0.0 }
 0x1fc   : > { %v1273_v12 = vpop.f32.mrb[32].mxu1  ;;  %v1205_v13 = vadd.f32 %v1560_v8, %v2325_v10 }
 0x1fd   : > { %1310 = vst [vmem:[%s2334_s10 + $0x28] sm:$0xff] %v1301_v11  ;;  %v1274_v40 = vadd.f32 %v1273_v12, %v1202_v9  ;;  %v1646_v15 = vpop.f32.mrb[33].mxu1 }
 0x1fe   : > { %v1561_v16 = vpop.f32.mrb[36].mxu0  ;;  %v1276_v2 = vpop.f32.mrb[34].mxu1 }
 0x1ff   : > { %v1293_v18 = vadd.f32 %v1274_v40, %v1946_v57  ;;  %v1277_v14 = vadd.f32 %v1276_v2, %v1205_v13  ;;  %v1562_v53 = vpop.f32.mrb[37].mxu0  ;;  %v1647_v42 = vpop.f32.mrb[35].mxu1 }
 0x200   : > { %v1563_v21 = vadd.f32 %v1562_v53, %v1561_v16  ;;  %v1564_v22 = vpop.f32.mrb[38].mxu0 }
 0x201   : > { %v1302_v23 = vmax.f32 %v1293_v18, 0.0  ;;  %v1294_v26 = vadd.f32 %v1277_v14, %v1959_v0  ;;  %v1565_v29 = vpop.f32.mrb[39].mxu0 }
 0x202   : > { %v1210_v32 = vadd.f32 %v1563_v21, %v2325_v10 }
 0x203   : > { %1311 = vst [vmem:[%s2334_s10 + $0x30] sm:$0xff] %v1302_v23  ;;  %v1303_v28 = vmax.f32 %v1294_v26, 0.0 }
 0x204   : > { %v1281_v17 = vpop.f32.mrb[36].mxu1 }
 0x205   : > { %1312 = vst [vmem:[%s2334_s10 + $0x38] sm:$0xff] %v1303_v28  ;;  %v1282_v33 = vadd.f32 %v1281_v17, %v1210_v32  ;;  %v1650_v34 = vpop.f32.mrb[37].mxu1 }
 0x206   : > { %v1284_v35 = vpop.f32.mrb[38].mxu1 }
 0x207   : > { %v1295_v57 = vadd.f32 %v1282_v33, %v1998_v20  ;;  %v1651_v36 = vpop.f32.mrb[39].mxu1 }
 0x209   : > { %v1304_v19 = vmax.f32 %v1295_v57, 0.0 }
 0x20b   : > { %1313 = vst [vmem:[%s2334_s10 + $0x40] sm:$0xff] %v1304_v19 }
 0x20c PF: > { %s15_s18 = sadd.s32 1, %s1746_s18  }
 0x20d   : > { %p12_p4 = scmp.ge.s32.totalorder %s15_s18, 4  }
 0x20f   :  { %14 = sbr.rel (!%p12_p4) target bundleno = 1 (0x1), region = 70 }

</bundles_post_ra>
